<compile_context>
chip_gen: v5e
topology: v5e:2x2
jax: 0.10.0
libtpu: 0.0.40
codegen_flags: <defaults>
</compile_context>

<pallas_src>
import functools

import jax
import jax.numpy as jnp
from jax import lax
from jax.experimental import pallas as pl
from jax.experimental.pallas import tpu as pltpu

IN_FEATURES = 10
OUT_FEATURES = 5

# Below this many rows, pallas_call dispatch + pipeline prologue dwarfs the
# ~100 FLOPs / ~500 B of useful work -> use plain XLA (or fuse downstream).
_SMALL_BATCH_THRESHOLD = 1024


def linear_kernel(x_ref, w_ref, b_ref, o_ref):
    # x_ref: (TB, IN)   -- activations, PyTorch row-major layout
    # w_ref: (OUT, IN)  -- PyTorch nn.Linear weight layout, used as-is
    # b_ref: (OUT, 1)
    # o_ref: (OUT, TB)  -- lane-dense output tile (TB multiple of 128)
    #
    # y[o, b] = sum_k w[o, k] * x[b, k]
    # Default TPU matmul precision is fine at 1e-5 tolerance (K=10); pin
    # precision=lax.Precision.HIGHEST here if bit-faithful f32 parity with
    # PyTorch is required.
    acc = lax.dot_general(
        w_ref[...], x_ref[...],
        dimension_numbers=(((1,), (1,)), ((), ())),
        preferred_element_type=jnp.float32,
    )
    o_ref[...] = (acc + b_ref[...]).astype(o_ref.dtype)


@functools.partial(jax.jit, static_argnames=("block_b",))
def _linear_forward_pallas(x, weight, bias, *, block_b=8192):
    """Pallas path.  x: (B, IN) f32 -> (B, OUT) f32."""
    B = x.shape[0]
    b2d = bias.reshape(OUT_FEATURES, 1)

    if B <= block_b:
        # Single full-batch block: block dims equal full array dims, so the
        # (8, 128) tiling constraint is trivially satisfied for any B.
        tb = B
    else:
        tb = block_b  # multiple of 128 -> lane-dense unmasked output stores

    grid = (pl.cdiv(B, tb),)  # ragged last block handled by masked stores

    out_t = pl.pallas_call(
        linear_kernel,
        out_shape=jax.ShapeDtypeStruct((OUT_FEATURES, B), x.dtype),
        grid=grid,
        in_specs=[
            pl.BlockSpec((tb, IN_FEATURES), lambda i: (i, 0)),
            pl.BlockSpec((OUT_FEATURES, IN_FEATURES), lambda i: (0, 0)),
            pl.BlockSpec((OUT_FEATURES, 1), lambda i: (0, 0)),
        ],
        out_specs=pl.BlockSpec((OUT_FEATURES, tb), lambda i: (0, i)),
        compiler_params=pltpu.CompilerParams(
            # On v7x (2 TCs) consider pltpu.CORE_PARALLEL if the trace shows
            # a single core running all grid steps.
            dimension_semantics=("parallel",),
            vmem_limit_bytes=32 * 1024 * 1024,
        ),
    )(x, weight, b2d)

    # Transpose the small (5, B) slab back to nn.Linear's (B, 5) layout.
    # (A consumer kernel could take (OUT, B) directly and skip this.)
    return out_t.T


def linear_forward(x, weight, bias, *, block_b=8192, force_pallas=False):
    """y = x @ weight.T + bias   (PyTorch nn.Linear(10, 5) semantics).

    x:      (*, IN)   float32
    weight: (OUT, IN) float32 (PyTorch layout, used as-is)
    bias:   (OUT,)    float32
    returns (*, OUT)  float32
    """
    assert block_b % 128 == 0, "block_b must be a multiple of 128 (lane width)"
    lead = x.shape[:-1]
    x2d = x.reshape(-1, IN_FEATURES)
    B = x2d.shape[0]

    if B < _SMALL_BATCH_THRESHOLD and not force_pallas:
        # Dispatch-overhead dominated: plain XLA (ideally fused downstream).
        y = x2d @ weight.T + bias
    else:
        y = _linear_forward_pallas(x2d, weight, bias, block_b=block_b)

    return y.reshape(*lead, OUT_FEATURES)


def init_params(key):
    """Deterministic init matching nn.Linear's uniform(-1/sqrt(in), 1/sqrt(in))."""
    kw, kb = jax.random.split(key)
    bound = 1.0 / jnp.sqrt(jnp.float32(IN_FEATURES))
    weight = jax.random.uniform(
        kw, (OUT_FEATURES, IN_FEATURES), jnp.float32, -bound, bound)
    bias = jax.random.uniform(
        kb, (OUT_FEATURES,), jnp.float32, -bound, bound)
    return weight, bias


if __name__ == "__main__":
    key = jax.random.PRNGKey(0)
    k_x, k_x2, k_p = jax.random.split(key, 3)

    weight, bias = init_params(k_p)

    # Case 1: small batch consistent with the module's (*, 10) input.
    # Force the Pallas path so the kernel itself is exercised.
    B = 32
    x = jax.random.normal(k_x, (B, IN_FEATURES), jnp.float32)
    y = linear_forward(x, weight, bias, force_pallas=True)
    jax.block_until_ready(y)
    y_ref = x @ weight.T + bias
    assert y.shape == (B, OUT_FEATURES)
    assert jnp.allclose(y, y_ref, atol=1e-5, rtol=1e-5), "mismatch (small batch)"

    # Case 2: multi-step grid with a ragged last block (grid = cdiv(300, 128) = 3),
    # exercising the cdiv-grid / masked-store path.
    B2 = 300
    x2 = jax.random.normal(k_x2, (B2, IN_FEATURES), jnp.float32)
    y2 = linear_forward(x2, weight, bias, block_b=128, force_pallas=True)
    jax.block_until_ready(y2)
    y2_ref = x2 @ weight.T + bias
    assert y2.shape == (B2, OUT_FEATURES)
    assert jnp.allclose(y2, y2_ref, atol=1e-5, rtol=1e-5), "mismatch (tiled/ragged)"

    print("KERNEL_OK")
</pallas_src>

<mosaic_0001>
module attributes {stable_mosaic.version = 11 : i64} {
  func.func @linear_kernel(%arg0: i32, %arg1: memref<32x10xf32, #tpu.memory_space<vmem>>, %arg2: memref<5x10xf32, #tpu.memory_space<vmem>>, %arg3: memref<5x1xf32, #tpu.memory_space<vmem>>, %arg4: memref<5x32xf32, #tpu.memory_space<vmem>>) attributes {dimension_semantics = [#tpu.dimension_semantics<parallel>], iteration_bounds = array<i64: 1>, scalar_prefetch = 0 : i64, scratch_operands = 0 : i64, tpu.core_type = #tpu.core_type<tc>, window_params = [{transform_indices = @transform_0, window_bounds = array<i64: 32, 10>}, {pipeline_mode = #tpu.pipeline_mode<synchronous>, transform_indices = @transform_1, window_bounds = array<i64: 5, 10>}, {pipeline_mode = #tpu.pipeline_mode<synchronous>, transform_indices = @transform_2, window_bounds = array<i64: 5, 1>}, {transform_indices = @transform_3, window_bounds = array<i64: 5, 32>}]} {
    %c0 = arith.constant 0 : index
    %c0_0 = arith.constant 0 : index
    %0 = vector.load %arg2[%c0, %c0_0] : memref<5x10xf32, #tpu.memory_space<vmem>>, vector<5x10xf32>
    %c0_1 = arith.constant 0 : index
    %c0_2 = arith.constant 0 : index
    %1 = vector.load %arg1[%c0_1, %c0_2] : memref<32x10xf32, #tpu.memory_space<vmem>>, vector<32x10xf32>
    %cst = arith.constant dense<0.000000e+00> : vector<5x32xf32>
    %2 = tpu.matmul %0, %1, %cst {dimension_numbers = #tpu.dot_dimension_numbers<[1], [1], [0], [0], [0, 0, 1, 0], [], []>} : vector<5x10xf32>, vector<32x10xf32>, vector<5x32xf32> -> vector<5x32xf32>
    %c0_3 = arith.constant 0 : index
    %c0_4 = arith.constant 0 : index
    %3 = vector.load %arg3[%c0_3, %c0_4] : memref<5x1xf32, #tpu.memory_space<vmem>>, vector<5x1xf32>
    %4 = vector.broadcast %3 : vector<5x1xf32> to vector<5x32xf32>
    %5 = arith.addf %2, %4 : vector<5x32xf32>
    %c0_5 = arith.constant 0 : index
    %c0_6 = arith.constant 0 : index
    %6 = vector.load %arg4[%c0_5, %c0_6] : memref<5x32xf32, #tpu.memory_space<vmem>>, vector<5x32xf32>
    tpu.vector_store %arg4[%c0_5, %c0_6], %5 {strides = array<i32>} : memref<5x32xf32, #tpu.memory_space<vmem>>, vector<5x32xf32>,
    return
  }
  func.func @transform_0(%arg0: i32) -> (i32, i32) {
    %c0_i32 = arith.constant 0 : i32
    %c0_i32_0 = arith.constant 0 : i32
    return %arg0, %c0_i32 : i32, i32
  }
  func.func @transform_1(%arg0: i32) -> (i32, i32) {
    %c0_i32 = arith.constant 0 : i32
    %c0_i32_0 = arith.constant 0 : i32
    %c0_i32_1 = arith.constant 0 : i32
    return %c0_i32, %c0_i32_0 : i32, i32
  }
  func.func @transform_2(%arg0: i32) -> (i32, i32) {
    %c0_i32 = arith.constant 0 : i32
    %c0_i32_0 = arith.constant 0 : i32
    %c0_i32_1 = arith.constant 0 : i32
    return %c0_i32, %c0_i32_0 : i32, i32
  }
  func.func @transform_3(%arg0: i32) -> (i32, i32) {
    %c0_i32 = arith.constant 0 : i32
    %c0_i32_0 = arith.constant 0 : i32
    return %c0_i32, %arg0 : i32, i32
  }
}

</mosaic_0001>

<bundles_post_ra>
// kernel: _linear_forward_pallas.1
= control target key start
LH: loop header
LB: loop body
LE: loop exit
PB: predicated region body
PF: predicated region fallthrough
CT: control target
= control target key end

     0   :  { %vm26_vm0 = vcmask 80896   ;;  %v114_v1 = vmov 0   ;;  %s157_s0 = inlined_call_operand.vmem [shape: f32[32,10], index: 0, kind: input, shape index: {}]   ;;  %s158_s1 = inlined_call_operand.vmem [shape: f32[5,10], index: 1, kind: input, shape index: {}]   ;;  %s159_s2 = inlined_call_operand.vmem [shape: f32[5,1], index: 2, kind: input, shape index: {}]   ;;  %s160_s3 = inlined_call_operand.hbm [shape: f32[5,32], index: 3, kind: output, shape index: {}]  }
   0x1   :  { %v19_v0 = vld [vmem:[%s157_s0 + $0x18] sm:$0xff]  ;;  %87 = vset.pattern.permute.xlu0 %v114_v1  ;;  %v20_v2 = vld [vmem:[%s159_s2] sm:$0x1f]  ;;  %v18_v3 = vld [vmem:[%s157_s0 + $0x10] sm:$0xff] }
   0x2   :  { %80 = vmatpush.xpose.msk.msra.mxu0 %vm26_vm0, %v19_v0  ;;  %23 = vperm.xlu0 %87, %v20_v2  }
   0x3   :  { %8 = vsyncpa [#allocation3], 0  ;;  %v17_v4 = vld [vmem:[%s157_s0 + $0x8] sm:$0xff]  ;;  %v16_v5 = vld [vmem:[%s157_s0] sm:$0xff]  ;;  %s115_s2 = smov [#allocation2]   ;;  %s71_s27 = sshll.u32 %s160_s3, 4  ;;  %s72_s27 = int_to_ptr.hbm [resolvable:$true] %s71_s27 }
   0x4   :  { %v15_v6 = vld [vmem:[%s158_s1] sm:$0x1f]  ;;  %s69_s24 = sshll.u32 %s115_s2, 4  ;;  %vm62_vm1 = vcmask 258048   ;;  %s70_s24 = int_to_ptr.vmem [resolvable:$true] %s69_s24 }
   0x6   :  { %81 = vmatpush.xpose.msk.msra.mxu0 %vm26_vm0, %v18_v3 }
   0xa   :  { %82 = vmatpush.xpose.msk.msra.mxu0 %vm26_vm0, %v17_v4 }
   0xe   :  { %83 = vmatpush.xpose.msk.msra.mxu0 %vm26_vm0, %v16_v5 }
  0x11   :  { %84 = vmatmul.msk.f32.vlgmr.msra.gmra.mxu0 %vm26_vm0, %v15_v6 }
  0x74   :  { %v24_v7 = vpop.permute.xlu0 %23 }
  0x8e   :  { %v59_v8 = vpop.f32.mrf.mxu0 }
  0x8f   :  { %v60_v9 = vadd.f32 %v59_v8, %v24_v7 }
  0x91   :  { %63 = vst.msk [vmem:[#allocation2] sm:$0x1f] %vm62_vm1, %v60_v9 }
  0x92   :  { %74 = dma.vmem_to_hbm [thread:$0]  %s70_s24, 128, %s72_s27, [#allocation3]  }
  0x93   :  { %112 = dma.done.wait [#allocation3], 128  }
  0x94   :  { %113 = vsyncadd [#allocation3], 4294967168 }
  0x95   :  { %79 = vsyncpa [#allocation3], 1 }

</bundles_post_ra>
